<compile_context>
chip_gen: v7x
topology: tpu7x:2x2x1
jax: 0.10.0
libtpu: 0.0.40
codegen_flags: <defaults>
</compile_context>

<pallas_src>
import jax
import jax.numpy as jnp
from jax.experimental import pallas as pl
from jax.experimental.pallas import tpu as pltpu


def _op_layer_kernel(x_ref, w_ref, p_ref, o_ref, patches_ref):
    # x_ref:       (1, 1, C, TH+2, W+2)  padded input tile incl. 1-row/col halo (compute dtype)
    # w_ref:       (C, 9*C)              BN-scale-folded conv weights, col = (kh*3+kw)*C + c_in
    # p_ref:       (1, C, 2)             [:, :, 0] = BN shift, [:, :, 1] = per-sample multiplier
    # o_ref:       (1, C, TH*W)          output tile, spatial flattened on lanes (lane-dense)
    # patches_ref: (9*C, TH*W)           im2col scratch (compute dtype)
    C = x_ref.shape[2]
    TH = x_ref.shape[3] - 2
    W = x_ref.shape[4] - 2
    THW = TH * W

    # Build the im2col buffer once (one shifted copy per tap); the whole 3x3 conv then
    # collapses to a single MXU matmul with K = 9*C -> no accumulator RMW passes at all.
    for kh in range(3):
        for kw in range(3):
            tap = kh * 3 + kw
            patches_ref[tap * C:(tap + 1) * C, :] = (
                x_ref[0, 0, :, kh:kh + TH, kw:kw + W].reshape(C, THW))

    shift = p_ref[0, :, 0:1]   # (C, 1) f32  BN shift (scale already folded into w_ref)
    mult = p_ref[0, :, 1:2]    # (C, 1) f32  per-sample post-ReLU multiplier

    acc = jnp.dot(w_ref[...], patches_ref[...],
                  preferred_element_type=jnp.float32)          # (C, TH*W) f32, one matmul
    y = jnp.maximum(acc + shift, 0.0) * mult                   # BN shift -> ReLU -> * weights
    o_ref[0] = y.astype(o_ref.dtype)                           # single lane-dense store


def _tile_bytes(shape, itemsize):
    """Rough VMEM footprint of one buffer, accounting for (8, 128) tile padding."""
    dims = list(shape)
    if len(dims) < 2:
        dims = [1] * (2 - len(dims)) + dims
    dims[-1] = -(-dims[-1] // 128) * 128
    dims[-2] = -(-dims[-2] // 8) * 8
    n = 1
    for d in dims:
        n *= d
    return n * itemsize


def operation_layer(x_nchw, conv_w_oihw, bn_gamma, bn_beta, bn_mean, bn_var,
                    weights=None, eps=1e-4, compute_dtype=jnp.bfloat16, out_dtype=None):
    """Forward of OperationLayer. x_nchw: [N, C, H, W] (PyTorch layout). Returns NCHW."""
    N, C, H, W = x_nchw.shape
    Wp = W + 2
    out_dtype = x_nchw.dtype if out_dtype is None else out_dtype
    cb = jnp.dtype(compute_dtype).itemsize
    ob = jnp.dtype(out_dtype).itemsize

    # --- fold BN (eval mode) into the conv weights + a per-channel shift --------
    scale = (bn_gamma / jnp.sqrt(bn_var + eps)).astype(jnp.float32)          # (C,)
    shift = (bn_beta - bn_mean * scale).astype(jnp.float32)                  # (C,)
    w_folded = conv_w_oihw.astype(jnp.float32) * scale[:, None, None, None]  # OIHW
    # (c_out, kh, kw, c_in) -> (C, 9C); column order matches the im2col row order.
    w2 = jnp.transpose(w_folded, (0, 2, 3, 1)).reshape(C, 9 * C).astype(compute_dtype)

    # --- per-(sample, channel) post-ReLU multiplier (PyTorch `op(x) * weights`) --
    # TODO(synk): spatially varying `weights` (e.g. (N, C, H, W) with H, W > 1) is not
    #             supported in-kernel; only multipliers broadcastable to (N, C) are handled.
    if weights is None:
        mult = jnp.ones((N, C), jnp.float32)
    else:
        w_arr = jnp.asarray(weights, jnp.float32)
        if w_arr.ndim == 0:
            mult = jnp.full((N, C), w_arr, jnp.float32)
        else:
            while w_arr.ndim > 2 and w_arr.shape[-1] == 1:
                w_arr = w_arr[..., 0]
            if w_arr.ndim == 1:
                w_arr = w_arr[:, None]
            mult = jnp.broadcast_to(w_arr, (N, C))
    params = jnp.stack([jnp.broadcast_to(shift[None, :], (N, C)), mult],
                       axis=-1).astype(jnp.float32)                          # (N, C, 2)

    # --- generation-aware VMEM budget + H-tile selection -------------------------
    try:
        vmem_cap = int(pltpu.get_tpu_info().vmem_capacity_bytes)   # 128 MiB v5e/v6e, 64 MiB v7x
    except Exception:
        vmem_cap = 64 * 2**20                                      # conservative fallback
    budget = max(vmem_cap - 16 * 2**20, 32 * 2**20)

    def est(th):
        thw = th * W
        return (2 * _tile_bytes((C, th + 2, Wp), cb)      # double-buffered input tile
                + 2 * _tile_bytes((C, 9 * C), cb)         # weights (grid-invariant)
                + 2 * _tile_bytes((C, 2), 4)              # params
                + 2 * _tile_bytes((C, thw), ob)           # double-buffered output tile
                + _tile_bytes((9 * C, thw), cb)           # im2col scratch
                + 2 * _tile_bytes((C, thw), 4))           # f32 matmul result + temps

    # Valid tile heights: output block last dim TH*W must be a multiple of 128 (lane-dense,
    # unmasked stores) or cover the whole sample (TH == H).
    cands = sorted({t for t in range(1, H + 1)
                    if H % t == 0 and (t == H or (t * W) % 128 == 0)}, reverse=True)
    fitting = [t for t in cands if est(t) <= budget] or [cands[-1]]
    # Prefer the largest fitting tile that still leaves a few grid steps for pipelining /
    # v7x megacore balance; otherwise take the largest that fits (v5e/v6e like big tiles).
    preferred = [t for t in fitting if N * (H // t) >= 4]
    TH = preferred[0] if preferred else fitting[0]
    NH = H // TH
    vmem_limit = int(min(budget, max(2 * est(TH) + (8 << 20), 32 << 20)))

    # --- input prep: pad + cast + pre-slice overlapping (TH+2)-row halo bands ----
    # One fused XLA pass; replaces v1's NCHW<->NHWC transposes and in-kernel halo zeroing,
    # and keeps per-step VMEM bounded for any H (auto-pipelined, megacore-safe).
    x_pad = jnp.pad(x_nchw.astype(compute_dtype), ((0, 0), (0, 0), (1, 1), (1, 1)))
    row_idx = jnp.arange(NH)[:, None] * TH + jnp.arange(TH + 2)[None, :]     # (NH, TH+2)
    x_tiles = jnp.moveaxis(x_pad[:, :, row_idx, :], 2, 1)                    # (N, NH, C, TH+2, Wp)

    cost = pl.CostEstimate(
        flops=int(2 * 9 * N * H * W * C * C),
        transcendentals=0,
        bytes_accessed=int(x_tiles.size * cb + N * C * H * W * ob
                           + w2.size * cb + params.size * 4))

    out_flat = pl.pallas_call(
        _op_layer_kernel,
        out_shape=jax.ShapeDtypeStruct((N, C, H * W), out_dtype),
        grid_spec=pltpu.PrefetchScalarGridSpec(
            num_scalar_prefetch=0,
            grid=(N, NH),
            in_specs=[
                pl.BlockSpec((1, 1, C, TH + 2, Wp), lambda n, h: (n, h, 0, 0, 0)),
                pl.BlockSpec((C, 9 * C), lambda n, h: (0, 0)),
                pl.BlockSpec((1, C, 2), lambda n, h: (n, 0, 0)),
            ],
            out_specs=pl.BlockSpec((1, C, TH * W), lambda n, h: (n, 0, h)),
            scratch_shapes=[pltpu.VMEM((9 * C, TH * W), compute_dtype)],    # im2col buffer
        ),
        compiler_params=pltpu.CompilerParams(
            dimension_semantics=("parallel", "parallel"),   # independent (n, h) tiles
            vmem_limit_bytes=vmem_limit,
        ),
        cost_estimate=cost,
    )(x_tiles, w2, params)

    return out_flat.reshape(N, C, H, W)                     # already NCHW: no transpose


def _reference(x_nchw, conv_w_oihw, bn_gamma, bn_beta, bn_mean, bn_var,
               weights=None, eps=1e-4):
    """Pure-JAX reference (lax conv), mirrors PyTorch eval-mode forward."""
    y = jax.lax.conv_general_dilated(
        x_nchw.astype(jnp.float32), conv_w_oihw.astype(jnp.float32),
        window_strides=(1, 1), padding=((1, 1), (1, 1)),
        dimension_numbers=('NCHW', 'OIHW', 'NCHW'))
    scale = bn_gamma / jnp.sqrt(bn_var + eps)
    shift = bn_beta - bn_mean * scale
    y = y * scale[None, :, None, None] + shift[None, :, None, None]
    y = jnp.maximum(y, 0.0)
    if weights is not None:
        N, C = x_nchw.shape[0], x_nchw.shape[1]
        y = y * jnp.asarray(weights, jnp.float32).reshape(N, C, 1, 1)
    return y.astype(x_nchw.dtype)


if __name__ == "__main__":
    N, C, H, W = 2, 4, 16, 16
    key = jax.random.PRNGKey(0)
    kx, kw, kg, kb, km, kv, kq = jax.random.split(key, 7)

    x = jax.random.normal(kx, (N, C, H, W), jnp.float32)
    conv_w = 0.1 * jax.random.normal(kw, (C, C, 3, 3), jnp.float32)     # OIHW
    bn_gamma = 1.0 + 0.1 * jax.random.normal(kg, (C,), jnp.float32)
    bn_beta = 0.1 * jax.random.normal(kb, (C,), jnp.float32)
    bn_mean = 0.05 * jax.random.normal(km, (C,), jnp.float32)
    bn_var = 1.0 + 0.1 * jax.random.uniform(kv, (C,), jnp.float32)
    mult_weights = jax.random.uniform(kq, (N, C), jnp.float32)          # the `weights` arg

    ref_w = _reference(x, conv_w, bn_gamma, bn_beta, bn_mean, bn_var, mult_weights)
    ref_n = _reference(x, conv_w, bn_gamma, bn_beta, bn_mean, bn_var, None)

    # f32 matmul path (tight tolerance).
    out_f32 = jax.block_until_ready(operation_layer(
        x, conv_w, bn_gamma, bn_beta, bn_mean, bn_var, mult_weights,
        compute_dtype=jnp.float32))
    assert jnp.allclose(out_f32, ref_w, rtol=1e-4, atol=1e-4), "mismatch (f32 weights path)"

    # Default bf16 matmul path (f32 accumulation) -> looser tolerance.
    out_bf16 = jax.block_until_ready(operation_layer(
        x, conv_w, bn_gamma, bn_beta, bn_mean, bn_var, mult_weights))
    assert jnp.allclose(out_bf16, ref_w, rtol=3e-2, atol=3e-2), "mismatch (bf16 weights path)"

    # weights=None path.
    out_none = jax.block_until_ready(operation_layer(
        x, conv_w, bn_gamma, bn_beta, bn_mean, bn_var, None,
        compute_dtype=jnp.float32))
    assert jnp.allclose(out_none, ref_n, rtol=1e-4, atol=1e-4), "mismatch (no-weights path)"

    print("KERNEL_OK")
</pallas_src>

<mosaic_0001>
module attributes {stable_mosaic.version = 11 : i64} {
  func.func @_op_layer_kernel(%arg0: i32, %arg1: i32, %arg2: memref<1x1x4x10x18xf32, #tpu.memory_space<vmem>>, %arg3: memref<4x36xf32, #tpu.memory_space<vmem>>, %arg4: memref<1x4x2xf32, #tpu.memory_space<vmem>>, %arg5: memref<1x4x128xf32, #tpu.memory_space<vmem>>, %arg6: memref<36x128xf32, #tpu.memory_space<vmem>>) attributes {dimension_semantics = [#tpu.dimension_semantics<parallel>, #tpu.dimension_semantics<parallel>], iteration_bounds = array<i64: 2, 2>, scalar_prefetch = 0 : i64, scratch_operands = 1 : i64, tpu.core_type = #tpu.core_type<tc>, window_params = [{transform_indices = @transform_0, window_bounds = array<i64: 1, 1, 4, 10, 18>}, {pipeline_mode = #tpu.pipeline_mode<synchronous>, transform_indices = @transform_1, window_bounds = array<i64: 4, 36>}, {transform_indices = @transform_2, window_bounds = array<i64: 1, 4, 2>}, {transform_indices = @transform_3, window_bounds = array<i64: 1, 4, 128>}]} {
    %c0 = arith.constant 0 : index
    %c0_0 = arith.constant 0 : index
    %c0_1 = arith.constant 0 : index
    %c0_2 = arith.constant 0 : index
    %c0_3 = arith.constant 0 : index
    %0 = vector.load %arg2[%c0, %c0_0, %c0_1, %c0_2, %c0_3] : memref<1x1x4x10x18xf32, #tpu.memory_space<vmem>>, vector<1x1x4x8x16xf32>
    %1 = vector.shape_cast %0 : vector<1x1x4x8x16xf32> to vector<4x8x16xf32>
    %2 = vector.shape_cast %1 : vector<4x8x16xf32> to vector<4x128xf32>
    %c0_4 = arith.constant 0 : index
    %c0_5 = arith.constant 0 : index
    %3 = vector.load %arg6[%c0_4, %c0_5] : memref<36x128xf32, #tpu.memory_space<vmem>>, vector<4x128xf32>
    tpu.vector_store %arg6[%c0_4, %c0_5], %2 {strides = array<i32>} : memref<36x128xf32, #tpu.memory_space<vmem>>, vector<4x128xf32>,
    %c0_6 = arith.constant 0 : index
    %c0_7 = arith.constant 0 : index
    %c0_8 = arith.constant 0 : index
    %c0_9 = arith.constant 0 : index
    %c1 = arith.constant 1 : index
    %4 = vector.load %arg2[%c0_6, %c0_7, %c0_8, %c0_9, %c1] : memref<1x1x4x10x18xf32, #tpu.memory_space<vmem>>, vector<1x1x4x8x16xf32>
    %5 = vector.shape_cast %4 : vector<1x1x4x8x16xf32> to vector<4x8x16xf32>
    %6 = vector.shape_cast %5 : vector<4x8x16xf32> to vector<4x128xf32>
    %c4 = arith.constant 4 : index
    %c0_10 = arith.constant 0 : index
    %7 = vector.load %arg6[%c4, %c0_10] : memref<36x128xf32, #tpu.memory_space<vmem>>, vector<4x128xf32>
    tpu.vector_store %arg6[%c4, %c0_10], %6 {strides = array<i32>} : memref<36x128xf32, #tpu.memory_space<vmem>>, vector<4x128xf32>,
    %c0_11 = arith.constant 0 : index
    %c0_12 = arith.constant 0 : index
    %c0_13 = arith.constant 0 : index
    %c0_14 = arith.constant 0 : index
    %c2 = arith.constant 2 : index
    %8 = vector.load %arg2[%c0_11, %c0_12, %c0_13, %c0_14, %c2] : memref<1x1x4x10x18xf32, #tpu.memory_space<vmem>>, vector<1x1x4x8x16xf32>
    %9 = vector.shape_cast %8 : vector<1x1x4x8x16xf32> to vector<4x8x16xf32>
    %10 = vector.shape_cast %9 : vector<4x8x16xf32> to vector<4x128xf32>
    %c8 = arith.constant 8 : index
    %c0_15 = arith.constant 0 : index
    %11 = vector.load %arg6[%c8, %c0_15] : memref<36x128xf32, #tpu.memory_space<vmem>>, vector<4x128xf32>
    tpu.vector_store %arg6[%c8, %c0_15], %10 {strides = array<i32>} : memref<36x128xf32, #tpu.memory_space<vmem>>, vector<4x128xf32>,
    %c0_16 = arith.constant 0 : index
    %c0_17 = arith.constant 0 : index
    %c0_18 = arith.constant 0 : index
    %c1_19 = arith.constant 1 : index
    %c0_20 = arith.constant 0 : index
    %12 = vector.load %arg2[%c0_16, %c0_17, %c0_18, %c1_19, %c0_20] : memref<1x1x4x10x18xf32, #tpu.memory_space<vmem>>, vector<1x1x4x8x16xf32>
    %13 = vector.shape_cast %12 : vector<1x1x4x8x16xf32> to vector<4x8x16xf32>
    %14 = vector.shape_cast %13 : vector<4x8x16xf32> to vector<4x128xf32>
    %c12 = arith.constant 12 : index
    %c0_21 = arith.constant 0 : index
    %15 = vector.load %arg6[%c12, %c0_21] : memref<36x128xf32, #tpu.memory_space<vmem>>, vector<4x128xf32>
    tpu.vector_store %arg6[%c12, %c0_21], %14 {strides = array<i32>} : memref<36x128xf32, #tpu.memory_space<vmem>>, vector<4x128xf32>,
    %c0_22 = arith.constant 0 : index
    %c0_23 = arith.constant 0 : index
    %c0_24 = arith.constant 0 : index
    %c1_25 = arith.constant 1 : index
    %c1_26 = arith.constant 1 : index
    %16 = vector.load %arg2[%c0_22, %c0_23, %c0_24, %c1_25, %c1_26] : memref<1x1x4x10x18xf32, #tpu.memory_space<vmem>>, vector<1x1x4x8x16xf32>
    %17 = vector.shape_cast %16 : vector<1x1x4x8x16xf32> to vector<4x8x16xf32>
    %18 = vector.shape_cast %17 : vector<4x8x16xf32> to vector<4x128xf32>
    %c16 = arith.constant 16 : index
    %c0_27 = arith.constant 0 : index
    %19 = vector.load %arg6[%c16, %c0_27] : memref<36x128xf32, #tpu.memory_space<vmem>>, vector<4x128xf32>
    tpu.vector_store %arg6[%c16, %c0_27], %18 {strides = array<i32>} : memref<36x128xf32, #tpu.memory_space<vmem>>, vector<4x128xf32>,
    %c0_28 = arith.constant 0 : index
    %c0_29 = arith.constant 0 : index
    %c0_30 = arith.constant 0 : index
    %c1_31 = arith.constant 1 : index
    %c2_32 = arith.constant 2 : index
    %20 = vector.load %arg2[%c0_28, %c0_29, %c0_30, %c1_31, %c2_32] : memref<1x1x4x10x18xf32, #tpu.memory_space<vmem>>, vector<1x1x4x8x16xf32>
    %21 = vector.shape_cast %20 : vector<1x1x4x8x16xf32> to vector<4x8x16xf32>
    %22 = vector.shape_cast %21 : vector<4x8x16xf32> to vector<4x128xf32>
    %c20 = arith.constant 20 : index
    %c0_33 = arith.constant 0 : index
    %23 = vector.load %arg6[%c20, %c0_33] : memref<36x128xf32, #tpu.memory_space<vmem>>, vector<4x128xf32>
    tpu.vector_store %arg6[%c20, %c0_33], %22 {strides = array<i32>} : memref<36x128xf32, #tpu.memory_space<vmem>>, vector<4x128xf32>,
    %c0_34 = arith.constant 0 : index
    %c0_35 = arith.constant 0 : index
    %c0_36 = arith.constant 0 : index
    %c2_37 = arith.constant 2 : index
    %c0_38 = arith.constant 0 : index
    %24 = vector.load %arg2[%c0_34, %c0_35, %c0_36, %c2_37, %c0_38] : memref<1x1x4x10x18xf32, #tpu.memory_space<vmem>>, vector<1x1x4x8x16xf32>
    %25 = vector.shape_cast %24 : vector<1x1x4x8x16xf32> to vector<4x8x16xf32>
    %26 = vector.shape_cast %25 : vector<4x8x16xf32> to vector<4x128xf32>
    %c24 = arith.constant 24 : index
    %c0_39 = arith.constant 0 : index
    %27 = vector.load %arg6[%c24, %c0_39] : memref<36x128xf32, #tpu.memory_space<vmem>>, vector<4x128xf32>
    tpu.vector_store %arg6[%c24, %c0_39], %26 {strides = array<i32>} : memref<36x128xf32, #tpu.memory_space<vmem>>, vector<4x128xf32>,
    %c0_40 = arith.constant 0 : index
    %c0_41 = arith.constant 0 : index
    %c0_42 = arith.constant 0 : index
    %c2_43 = arith.constant 2 : index
    %c1_44 = arith.constant 1 : index
    %28 = vector.load %arg2[%c0_40, %c0_41, %c0_42, %c2_43, %c1_44] : memref<1x1x4x10x18xf32, #tpu.memory_space<vmem>>, vector<1x1x4x8x16xf32>
    %29 = vector.shape_cast %28 : vector<1x1x4x8x16xf32> to vector<4x8x16xf32>
    %30 = vector.shape_cast %29 : vector<4x8x16xf32> to vector<4x128xf32>
    %c28 = arith.constant 28 : index
    %c0_45 = arith.constant 0 : index
    %31 = vector.load %arg6[%c28, %c0_45] : memref<36x128xf32, #tpu.memory_space<vmem>>, vector<4x128xf32>
    tpu.vector_store %arg6[%c28, %c0_45], %30 {strides = array<i32>} : memref<36x128xf32, #tpu.memory_space<vmem>>, vector<4x128xf32>,
    %c0_46 = arith.constant 0 : index
    %c0_47 = arith.constant 0 : index
    %c0_48 = arith.constant 0 : index
    %c2_49 = arith.constant 2 : index
    %c2_50 = arith.constant 2 : index
    %32 = vector.load %arg2[%c0_46, %c0_47, %c0_48, %c2_49, %c2_50] : memref<1x1x4x10x18xf32, #tpu.memory_space<vmem>>, vector<1x1x4x8x16xf32>
    %33 = vector.shape_cast %32 : vector<1x1x4x8x16xf32> to vector<4x8x16xf32>
    %34 = vector.shape_cast %33 : vector<4x8x16xf32> to vector<4x128xf32>
    %c32 = arith.constant 32 : index
    %c0_51 = arith.constant 0 : index
    %35 = vector.load %arg6[%c32, %c0_51] : memref<36x128xf32, #tpu.memory_space<vmem>>, vector<4x128xf32>
    tpu.vector_store %arg6[%c32, %c0_51], %34 {strides = array<i32>} : memref<36x128xf32, #tpu.memory_space<vmem>>, vector<4x128xf32>,
    %c0_52 = arith.constant 0 : index
    %c0_53 = arith.constant 0 : index
    %c0_54 = arith.constant 0 : index
    %36 = vector.load %arg4[%c0_52, %c0_53, %c0_54] : memref<1x4x2xf32, #tpu.memory_space<vmem>>, vector<1x4x1xf32>
    %37 = vector.shape_cast %36 : vector<1x4x1xf32> to vector<4x1xf32>
    %c0_55 = arith.constant 0 : index
    %c0_56 = arith.constant 0 : index
    %c1_57 = arith.constant 1 : index
    %38 = vector.load %arg4[%c0_55, %c0_56, %c1_57] : memref<1x4x2xf32, #tpu.memory_space<vmem>>, vector<1x4x1xf32>
    %39 = vector.shape_cast %38 : vector<1x4x1xf32> to vector<4x1xf32>
    %c0_58 = arith.constant 0 : index
    %c0_59 = arith.constant 0 : index
    %40 = vector.load %arg3[%c0_58, %c0_59] : memref<4x36xf32, #tpu.memory_space<vmem>>, vector<4x36xf32>
    %c0_60 = arith.constant 0 : index
    %c0_61 = arith.constant 0 : index
    %41 = vector.load %arg6[%c0_60, %c0_61] : memref<36x128xf32, #tpu.memory_space<vmem>>, vector<36x128xf32>
    %cst = arith.constant dense<0.000000e+00> : vector<4x128xf32>
    %42 = tpu.matmul %40, %41, %cst {dimension_numbers = #tpu.dot_dimension_numbers<[1], [0], [0], [1], [0, 0, 1, 1], [], []>} : vector<4x36xf32>, vector<36x128xf32>, vector<4x128xf32> -> vector<4x128xf32>
    %43 = vector.broadcast %37 : vector<4x1xf32> to vector<4x128xf32>
    %44 = arith.addf %42, %43 : vector<4x128xf32>
    %cst_62 = arith.constant 0.000000e+00 : f32
    %45 = vector.broadcast %cst_62 : f32 to vector<4x128xf32>
    %46 = arith.maximumf %44, %45 : vector<4x128xf32>
    %47 = vector.broadcast %39 : vector<4x1xf32> to vector<4x128xf32>
    %48 = arith.mulf %46, %47 : vector<4x128xf32>
    %c0_63 = arith.constant 0 : index
    %c0_64 = arith.constant 0 : index
    %c0_65 = arith.constant 0 : index
    %49 = vector.load %arg5[%c0_63, %c0_64, %c0_65] : memref<1x4x128xf32, #tpu.memory_space<vmem>>, vector<1x4x128xf32>
    %50 = vector.shape_cast %49 : vector<1x4x128xf32> to vector<4x128xf32>
    %51 = vector.shape_cast %48 : vector<4x128xf32> to vector<1x4x128xf32>
    tpu.vector_store %arg5[%c0_63, %c0_64, %c0_65], %51 {strides = array<i32>} : memref<1x4x128xf32, #tpu.memory_space<vmem>>, vector<1x4x128xf32>,
    return
  }
  func.func @transform_0(%arg0: i32, %arg1: i32) -> (i32, i32, i32, i32, i32) {
    %c0_i32 = arith.constant 0 : i32
    %c0_i32_0 = arith.constant 0 : i32
    %c0_i32_1 = arith.constant 0 : i32
    %c0_i32_2 = arith.constant 0 : i32
    return %arg0, %arg1, %c0_i32, %c0_i32_0, %c0_i32_1 : i32, i32, i32, i32, i32
  }
  func.func @transform_1(%arg0: i32, %arg1: i32) -> (i32, i32) {
    %c0_i32 = arith.constant 0 : i32
    %c0_i32_0 = arith.constant 0 : i32
    %c0_i32_1 = arith.constant 0 : i32
    return %c0_i32, %c0_i32_0 : i32, i32
  }
  func.func @transform_2(%arg0: i32, %arg1: i32) -> (i32, i32, i32) {
    %c0_i32 = arith.constant 0 : i32
    %c0_i32_0 = arith.constant 0 : i32
    %c0_i32_1 = arith.constant 0 : i32
    return %arg0, %c0_i32, %c0_i32_0 : i32, i32, i32
  }
  func.func @transform_3(%arg0: i32, %arg1: i32) -> (i32, i32, i32) {
    %c0_i32 = arith.constant 0 : i32
    %c0_i32_0 = arith.constant 0 : i32
    return %arg0, %c0_i32, %arg1 : i32, i32, i32
  }
}

</mosaic_0001>

<bundles_post_ra>
// kernel: tpu_custom_call.1
= control target key start
LH: loop header
LB: loop body
LE: loop exit
PB: predicated region body
PF: predicated region fallthrough
CT: control target
= control target key end

     0   :  { %8 = vsyncpa [#allocation4], 0  ;;  %s2380_s0 = inlined_call_operand.vmem [shape: f32[2,2,4,10,18], index: 0, kind: input, shape index: {}]   ;;  %s2381_s1 = inlined_call_operand.vmem [shape: f32[4,36], index: 1, kind: input, shape index: {}]   ;;  %s2382_s2 = inlined_call_operand.vmem [shape: f32[2,4,2], index: 2, kind: input, shape index: {}]   ;;  %s2383_s3 = inlined_call_operand.hbm [shape: f32[2,4,256], index: 3, kind: output, shape index: {}]  }
   0x1   :  { %10 = vsyncpa [#allocation4 + $0x1], 0  ;;  %s1759_s12 = smov 0   ;;  %s1761_s13 = smov 0  }
   0x2   :  { %s1763_s14 = smov 0   ;;  %s1765_s15 = smov 0  }
   0x3   :  { %s1767_s16 = smov 0   ;;  %s1769_s17 = smov 0  }
   0x4   :  { %s1771_s18 = smov 0   ;;  %s1773_s19 = smov 0  }
   0x5 LB: > { %s1495_s20 = sadd.s32 4294967295, %s1720_s19   ;;  %s1496_s21 = sadd.s32 4294967294, %s1720_s19   ;;  %s1720_s19 = sphi %s1773_s19, %s16_s19   ;;  %s1716_s18 = sphi %s1771_s18, %s2392_s18   ;;  %s1712_s17 = sphi %s1769_s17, %s2391_s17   ;;  %s1708_s16 = sphi %s1767_s16, %s2390_s16   ;;  %s1704_s15 = sphi %s1765_s15, %s2389_s15   ;;  %s1700_s14 = sphi %s1763_s14, %s2388_s14   ;;  %s1696_s13 = sphi %s1761_s13, %s2387_s13   ;;  %s1692_s12 = sphi %s1759_s12, %s2386_s12  }
   0x6   : > { %s25_s22 = sadd.s32 1, %s1712_s17  ;;  %s28_s23 = sadd.s32 1, %s1716_s18 }
   0x7   : > { %p26_p0 = scmp.ge.s32.totalorder %s25_s22, 2  ;;  %p122_p1 = scmp.ne.s32.totalorder %s1700_s14, %s1696_s13 }
   0x8   : > { %p123_p2 = scmp.eq.s32.totalorder %s1495_s20, 3  ;;  %p128_p5 = scmp.ne.s32.totalorder %s1696_s13, %s1692_s12 }
   0x9   : > { %s2394_s22 = smov (%p26_p0, %s25_s22), 0  ;;  %s2396_s23 = smov (!%p26_p0, %s28_s23), %s1716_s18 }
   0xa   : > { %s108_s24 = ssub.s32 %s1712_s17, %s2394_s22  ;;  %p1810_p3 = por %p123_p2, %p122_p1 }
   0xb   : > { %p30_p4 = scmp.ge.s32.totalorder %s2396_s23, 2  ;;  %p129_p6 = scmp.eq.s32.totalorder %s1496_s21, 3 }
   0xc   : > { %p1499_p7 = scmp.ge.s32.totalorder %s1720_s19, 1  ;;  %p169_p9 = scmp.lt.s32.totalorder %s1720_s19, 5 }
   0xd   : > { %s2398_s23 = smov (%p30_p4, %s2396_s23), 0  ;;  %p1819_p8 = por %p129_p6, %p128_p5 }
   0xe   : > { %s107_s27 = ssub.s32 %s1716_s18, %s2398_s23  ;;  %s112_s28 = sadd.s32 1, %s1700_s14 }
   0xf   : > { %s109_s29 = sor.u32 %s108_s24, %s107_s27  ;;  %p170_p10 = pnand %p1499_p7, %p169_p9 }
  0x10   : > { %p110_p11 = scmp.eq.s32.totalorder %s109_s29, 0  ;;  %p201_p12 = scmp.lt.s32.totalorder (!%p170_p10), %s1708_s16, 1  ;;  %v1724_v8 = vmov (!%p170_p10), 1983009808   ;;  %v223_v10 = vlaneseq (!%p170_p10)  ;;  %v1725_v16 = vmov (!%p170_p10), 1934713408  }
  0x11   : > { %173 = sbr.rel (%p170_p10) target bundleno = 626 (0x272), region = 32  ;;  %p203_p13 = scmp.lt.s32.totalorder (!%p170_p10), %s1704_s15, 1  ;;  %v221_v9 = vunpack.c.l.s4 (!%p170_p10), %v1724_v8  ;;  %v253_v17 = vunpack.c.l.s4 (!%p170_p10), %v1725_v16  ;;  %v1726_v39 = vmov (!%p170_p10), 0.0   ;;  %vm314_vm0 = vcmask (!%p170_p10), 130048  }
  0x12   : > { %s1828_s30 = scalar_select %p110_p11, %s1700_s14, %s112_s28  }
  0x13   : > { %s1722_s21 = smov (!%p170_p10), 127   ;;  %s1723_s24 = smov (!%p170_p10), 126   ;;  %v222_v11 = vunpack.c.0.s8 (!%p170_p10), %v221_v9  ;;  %v224_v12 = vshrl.u32 (!%p170_p10), %v223_v10, 7  ;;  %v254_v24 = vunpack.c.0.s8 (!%p170_p10), %v253_v17  ;;  %vm316_vm1 = vcmask (!%p170_p10), 261120  }
  0x14   : > { %s1727_s27 = smov (!%p170_p10), 16   ;;  %s1728_s28 = smov (!%p170_p10), 32   ;;  %vm318_vm2 = vcmask (!%p170_p10), 392192   ;;  %vm320_vm3 = vcmask (!%p170_p10), 523264   ;;  %vm322_vm4 = vcmask (!%p170_p10), 654336   ;;  %vm324_vm5 = vcmask (!%p170_p10), 785408  }
  0x15   : > { %v1886_v14 = vsub.s32 (!%p170_p10), %v222_v11, %v224_v12  ;;  %v1905_v30 = vsub.s32 (!%p170_p10), %v254_v24, %v224_v12  ;;  %s1729_s29 = smov (!%p170_p10), 48   ;;  %vm326_vm6 = vcmask (!%p170_p10), 916480   ;;  %vm1735_vm7 = vmmov (!%p170_p10), 0   ;;  %s1738_s11 = smov (!%p170_p10), [#allocation3]  }
  0x16   : > { %1528 = vmatprep.mubr.msk.f32.mxu0 (!%p170_p10), %vm1735_vm7, %v1726_v39  ;;  %vm1305_vm8 = vcmask (!%p170_p10), 1043456   ;;  %vm1301_vm9 = vcmask (!%p170_p10), 293888  }
  0x18   : > { %s1833_s4 = scalar_select %p201_p12, %s1708_s16, 1 }
  0x19   : > { %s204_s5 = scalar_select %p203_p13, %s1704_s15, 1 }
  0x1a   : > { %s1502_s6 = sshll.u32 %s1833_s4, 4 }
  0x1b   : > { %s1501_s7 = sshll.u32 %s204_s5, 3  ;;  %s1730_s5 = smov 64  }
  0x1c   : > { %s207_s8 = sadd.s32 %s1502_s6, %s1501_s7  ;;  %s1731_s6 = smov 80  }
  0x1d   : > { %s1503_s9 = sshll.u32 %s207_s8, 3  ;;  %s1732_s7 = smov 96  }
  0x1e   : > { %s1840_s20 = scalar_lea.vmem %s2380_s0, %s1503_s9  ;;  %s1733_s8 = smov 112  }
  0x1f   : > { %v1843_v0 = vld [vmem:[%s1840_s20 + $0x20] sm:$0xff]  ;;  %v1853_v2 = vld [vmem:[%s1840_s20 + $0x30] sm:$0xff]  ;;  %s1504_s9 = sshll.u32 %s1833_s4, 2 }
  0x20   : > { %v1846_v1 = vld [vmem:[%s1840_s20] sm:$0xff]  ;;  %341 = vrot.lane.b32.xlu1 %v1843_v0, %s1722_s21  ;;  %v1856_v3 = vld [vmem:[%s1840_s20 + $0x10] sm:$0xff] }
  0x21   : > { %337 = vrot.lane.b32.xlu0 %v1846_v1, %s1722_s21  ;;  %v1871_v4 = vld [vmem:[%s1840_s20 + $0x11] sm:$0xff]  ;;  %v685_v5 = vld [vmem:[%s1840_s20 + $0x1] sm:$0xff]  ;;  %v218_v13 = vcombine.low %v1846_v1, %v1843_v0  ;;  %v234_v15 = vcombine.low %v1856_v3, %v1853_v2  ;;  %v219_v34 = vcombine.high %v1846_v1, %v1843_v0  ;;  %v235_v36 = vcombine.high %v1856_v3, %v1853_v2 }
  0x22   : > { %v688_v6 = vld [vmem:[%s1840_s20 + $0x31] sm:$0xff]  ;;  %v687_v7 = vld [vmem:[%s1840_s20 + $0x21] sm:$0xff] }
  0x23   : > { %v581_v18 = vcombine.low %v685_v5, %v687_v7  ;;  %v597_v19 = vcombine.low %v1871_v4, %v688_v6  ;;  %v1042_v20 = vld [vmem:[%s1840_s20 + $0x12] sm:$0xff]  ;;  %v1041_v21 = vld [vmem:[%s1840_s20 + $0x2] sm:$0xff]  ;;  %v226_v22 = vrot.slane %v218_v13, %v1886_v14  ;;  %v242_v23 = vrot.slane %v234_v15, %v1886_v14 }
  0x24   : > { %343 = vrot.lane.b32.xlu1 %v1853_v2, %s1722_s21  ;;  %v1044_v27 = vld [vmem:[%s1840_s20 + $0x32] sm:$0xff]  ;;  %v1043_v28 = vld [vmem:[%s1840_s20 + $0x22] sm:$0xff]  ;;  %v582_v38 = vcombine.high %v685_v5, %v687_v7  ;;  %v598_v42 = vcombine.high %v1871_v4, %v688_v6  ;;  %v233_v43 = vrot.slane %v219_v34, %v1886_v14  ;;  %v249_v44 = vrot.slane %v235_v36, %v1886_v14  ;;  %s213_s20 = scalar_lea.vmem %s2382_s2, %s1504_s9 }
  0x25   : > { %339 = vrot.lane.b32.xlu0 %v1856_v3, %s1722_s21  ;;  %v589_v25 = vrot.slane %v581_v18, %v1886_v14  ;;  %v605_v26 = vrot.slane %v597_v19, %v1886_v14  ;;  %v250_v29 = vcombine.low %v226_v22, %v242_v23  ;;  %v251_v35 = vcombine.high %v226_v22, %v242_v23 }
  0x26   : > { %v937_v45 = vcombine.low %v1041_v21, %v1043_v28  ;;  %v953_v46 = vcombine.low %v1042_v20, %v1044_v27  ;;  %v596_v47 = vrot.slane %v582_v38, %v1886_v14  ;;  %v612_v50 = vrot.slane %v598_v42, %v1886_v14 }
  0x27   : > { %v613_v31 = vcombine.low %v589_v25, %v605_v26  ;;  %v1910_v32 = vrot.slane %v250_v29, %v1905_v30  ;;  %v614_v37 = vcombine.high %v589_v25, %v605_v26  ;;  %v265_v48 = vrot.slane %v251_v35, %v1905_v30 }
  0x28   : > { %463 = vrot.lane.b32.xlu1 %v1856_v3, %s1723_s24  ;;  %v266_v51 = vcombine.low %v233_v43, %v249_v44  ;;  %v945_v52 = vrot.slane %v937_v45, %v1886_v14  ;;  %v961_v53 = vrot.slane %v953_v46, %v1886_v14  ;;  %v629_v56 = vcombine.low %v596_v47, %v612_v50 }
  0x29   : > { %461 = vrot.lane.b32.xlu0 %v1846_v1, %s1723_s24  ;;  %v1913_v33 = vrot.slane %v613_v31, %v1905_v30  ;;  %v282_v40 = vcombine.high %v1910_v32, %v1726_v39  ;;  %v628_v49 = vrot.slane %v614_v37, %v1905_v30  ;;  %v283_v54 = vcombine.high %v265_v48, %v1726_v39 }
  0x2a   : > { %v938_v57 = vcombine.high %v1041_v21, %v1043_v28  ;;  %v954_v58 = vcombine.high %v1042_v20, %v1044_v27  ;;  %v969_v59 = vcombine.low %v945_v52, %v961_v53  ;;  %v274_v60 = vrot.slane %v266_v51, %v1905_v30 }
  0x2b   : > { %v645_v41 = vcombine.high %v1913_v33, %v1726_v39  ;;  %v646_v55 = vcombine.high %v628_v49, %v1726_v39  ;;  %v637_v61 = vrot.slane %v629_v56, %v1905_v30  ;;  %v630_v3 = vcombine.high %v596_v47, %v612_v50 }
  0x2c   : > { %467 = vrot.lane.b32.xlu1 %v1853_v2, %s1723_s24  ;;  %v1945_v62 = vrot.slane %v938_v57, %v1886_v14  ;;  %v1948_v63 = vrot.slane %v954_v58, %v1886_v14  ;;  %v1952_v1 = vrot.slane %v969_v59, %v1905_v30  ;;  %v970_v9 = vcombine.high %v945_v52, %v961_v53 }
  0x2d   : > { %465 = vrot.lane.b32.xlu0 %v1843_v0, %s1723_s24  ;;  %v284_v0 = vcombine.high %v274_v60, %v1726_v39  ;;  %v647_v2 = vcombine.high %v637_v61, %v1726_v39 }
  0x2e   : > { %v984_v11 = vrot.slane %v970_v9, %v1905_v30  ;;  %v985_v15 = vcombine.low %v1945_v62, %v1948_v63 }
  0x30   : > { %695 = vrot.lane.b32.xlu1 %v1871_v4, %s1722_s21  ;;  %v1002_v13 = vcombine.high %v984_v11, %v1726_v39  ;;  %v1979_v16 = vrot.slane %v985_v15, %v1905_v30 }
  0x31   : > { %693 = vrot.lane.b32.xlu0 %v685_v5, %s1722_s21 }
  0x34   : > { %699 = vrot.lane.b32.xlu1 %v688_v6, %s1722_s21 }
  0x35   : > { %697 = vrot.lane.b32.xlu0 %v687_v7, %s1722_s21 }
  0x38   : > { %819 = vrot.lane.b32.xlu1 %v1871_v4, %s1723_s24  ;;  %v986_v4 = vcombine.high %v1945_v62, %v1948_v63 }
  0x39   : > { %817 = vrot.lane.b32.xlu0 %v685_v5, %s1723_s24  ;;  %v1001_v5 = vcombine.high %v1952_v1, %v1726_v39 }
  0x3c   : > { %823 = vrot.lane.b32.xlu1 %v688_v6, %s1723_s24  ;;  %v267_v6 = vcombine.high %v233_v43, %v249_v44 }
  0x3d   : > { %821 = vrot.lane.b32.xlu0 %v687_v7, %s1723_s24  ;;  %v644_v7 = vrot.slane %v630_v3, %v1905_v30 }
  0x3e   : > { %v281_v8 = vrot.slane %v267_v6, %v1905_v30 }
  0x3f   : > { %v648_v10 = vcombine.high %v644_v7, %v1726_v39 }
  0x40   : > { %1051 = vrot.lane.b32.xlu1 %v1042_v20, %s1722_s21  ;;  %v285_v12 = vcombine.high %v281_v8, %v1726_v39 }
  0x41   : > { %1049 = vrot.lane.b32.xlu0 %v1041_v21, %s1722_s21 }
  0x44   : > { %1055 = vrot.lane.b32.xlu1 %v1044_v27, %s1722_s21 }
  0x45   : > { %1053 = vrot.lane.b32.xlu0 %v1043_v28, %s1722_s21 }
  0x48   : > { %1175 = vrot.lane.b32.xlu1 %v1042_v20, %s1723_s24 }
  0x49   : > { %1173 = vrot.lane.b32.xlu0 %v1041_v21, %s1723_s24 }
  0x4c   : > { %1179 = vrot.lane.b32.xlu1 %v1044_v27, %s1723_s24 }
  0x4d   : > { %1177 = vrot.lane.b32.xlu0 %v1043_v28, %s1723_s24  ;;  %s198_s24 = sand.u32 1, %s1696_s13  }
  0x50   : > { %650 = vrot.lane.b32.xlu1 %v645_v41, %s1727_s27 }
  0x51   : > { %287 = vrot.lane.b32.xlu0 %v282_v40, %s1727_s27 }
  0x54   : > { %654 = vrot.lane.b32.xlu1 %v628_v49, %s1728_s28 }
  0x55   : > { %291 = vrot.lane.b32.xlu0 %v265_v48, %s1728_s28 }
  0x58   : > { %658 = vrot.lane.b32.xlu1 %v646_v55, %s1729_s29 }
  0x59   : > { %295 = vrot.lane.b32.xlu0 %v283_v54, %s1729_s29 }
  0x5c   : > { %662 = vrot.lane.b32.xlu1 %v637_v61, %s1730_s5 }
  0x5d   : > { %299 = vrot.lane.b32.xlu0 %v274_v60, %s1730_s5 }
  0x60   : > { %666 = vrot.lane.b32.xlu1 %v647_v2, %s1731_s6 }
  0x61   : > { %303 = vrot.lane.b32.xlu0 %v284_v0, %s1731_s6 }
  0x64   : > { %670 = vrot.lane.b32.xlu1 %v644_v7, %s1732_s7 }
  0x65   : > { %1006 = vrot.lane.b32.xlu0 %v1001_v5, %s1727_s27 }
  0x68   : > { %674 = vrot.lane.b32.xlu1 %v648_v10, %s1733_s8 }
  0x69   : > { %307 = vrot.lane.b32.xlu0 %v281_v8, %s1732_s7 }
  0x6d   : > { %1010 = vrot.lane.b32.xlu0 %v984_v11, %s1728_s28 }
  0x71   : > { %311 = vrot.lane.b32.xlu0 %v285_v12, %s1733_s8 }
  0x75   : > { %1014 = vrot.lane.b32.xlu0 %v1002_v13, %s1729_s29 }
  0x79   : > { %1018 = vrot.lane.b32.xlu0 %v1979_v16, %s1730_s5 }
  0x92   : > { %v342_v17 = vpop.permute.xlu1 %341 }
  0x93   : > { %v338_v18 = vpop.permute.xlu0 %337 }
  0x94   : > { %v349_v19 = vcombine.low %v338_v18, %v342_v17  ;;  %v350_v20 = vcombine.high %v338_v18, %v342_v17 }
  0x96   : > { %v344_v21 = vpop.permute.xlu1 %343  ;;  %v1984_v25 = vrot.slane %v349_v19, %v1886_v14  ;;  %v364_v28 = vrot.slane %v350_v20, %v1886_v14 }
  0x97   : > { %v340_v22 = vpop.permute.xlu0 %339 }
  0x98   : > { %v365_v23 = vcombine.low %v340_v22, %v344_v21  ;;  %v366_v24 = vcombine.high %v340_v22, %v344_v21 }
  0x9a   : > { %v1987_v26 = vrot.slane %v365_v23, %v1886_v14  ;;  %v380_v27 = vrot.slane %v366_v24, %v1886_v14  ;;  %v464_v29 = vpop.permute.xlu1 %463 }
  0x9b   : > { %v462_v31 = vpop.permute.xlu0 %461 }
  0x9c   : > { %v382_v34 = vcombine.high %v1984_v25, %v1987_v26  ;;  %v397_v35 = vcombine.low %v364_v28, %v380_v27  ;;  %v398_v44 = vcombine.high %v364_v28, %v380_v27 }
  0x9e   : > { %v1994_v36 = vrot.slane %v382_v34, %v1905_v30  ;;  %v468_v37 = vpop.permute.xlu1 %467  ;;  %v1999_v45 = vrot.slane %v397_v35, %v1905_v30  ;;  %v2008_v54 = vrot.slane %v398_v44, %v1905_v30 }
  0x9f   : > { %v466_v38 = vpop.permute.xlu0 %465  ;;  %v489_v40 = vcombine.low %v464_v29, %v468_v37  ;;  %v490_v41 = vcombine.high %v464_v29, %v468_v37 }
  0xa0   : > { %v473_v42 = vcombine.low %v462_v31, %v466_v38  ;;  %v474_v43 = vcombine.high %v462_v31, %v466_v38  ;;  %422 = vrot.lane.b32.xlu1 %v1994_v36, %s1728_s28 }
  0xa1   : > { %v497_v46 = vrot.slane %v489_v40, %v1886_v14  ;;  %v504_v47 = vrot.slane %v490_v41, %v1886_v14 }
  0xa2   : > { %v481_v48 = vrot.slane %v473_v42, %v1886_v14  ;;  %v488_v49 = vrot.slane %v474_v43, %v1886_v14  ;;  %v696_v50 = vpop.permute.xlu1 %695 }
  0xa3   : > { %v694_v51 = vpop.permute.xlu0 %693 }
  0xa4   : > { %v506_v52 = vcombine.high %v481_v48, %v497_v46  ;;  %430 = vrot.lane.b32.xlu1 %v1999_v45, %s1730_s5  ;;  %v521_v53 = vcombine.low %v488_v49, %v504_v47  ;;  %v522_v60 = vcombine.high %v488_v49, %v504_v47  ;;  %v505_v20 = vcombine.low %v481_v48, %v497_v46 }
  0xa6   : > { %v520_v55 = vrot.slane %v506_v52, %v1905_v30  ;;  %v700_v56 = vpop.permute.xlu1 %699  ;;  %v529_v61 = vrot.slane %v521_v53, %v1905_v30  ;;  %v2025_v13 = vrot.slane %v522_v60, %v1905_v30  ;;  %v2051_v38 = vrot.slane %v505_v20, %v1905_v30 }
  0xa7   : > { %v698_v57 = vpop.permute.xlu0 %697  ;;  %v721_v58 = vcombine.low %v696_v50, %v700_v56  ;;  %v722_v0 = vcombine.high %v696_v50, %v700_v56 }
  0xa8   : > { %v705_v59 = vcombine.low %v694_v51, %v698_v57  ;;  %438 = vrot.lane.b32.xlu1 %v2008_v54, %s1732_s7  ;;  %546 = vrot.lane.b32.xlu0 %v520_v55, %s1728_s28  ;;  %v706_v3 = vcombine.high %v694_v51, %v698_v57  ;;  %v537_v49 = vcombine.high %v2051_v38, %v1726_v39 }
  0xa9   : > { %v729_v2 = vrot.slane %v721_v58, %v1886_v14  ;;  %v2019_v8 = vrot.slane %v722_v0, %v1886_v14  ;;  %v538_v60 = vcombine.high %v520_v55, %v1726_v39  ;;  %v539_v55 = vcombine.high %v529_v61, %v1726_v39 }
  0xaa   : > { %v713_v5 = vrot.slane %v705_v59, %v1886_v14  ;;  %v820_v6 = vpop.permute.xlu1 %819  ;;  %v2022_v9 = vrot.slane %v706_v3, %v1886_v14 }
  0xab   : > { %v818_v7 = vpop.permute.xlu0 %817 }
  0xac   : > { %554 = vrot.lane.b32.xlu0 %v529_v61, %s1730_s5  ;;  %v738_v10 = vcombine.high %v713_v5, %v729_v2  ;;  %v753_v21 = vcombine.low %v2022_v9, %v2019_v8  ;;  %v737_v59 = vcombine.low %v713_v5, %v729_v2 }
  0xae   : > { %v824_v11 = vpop.permute.xlu1 %823  ;;  %v2038_v24 = vrot.slane %v738_v10, %v1905_v30  ;;  %v2048_v37 = vrot.slane %v753_v21, %v1905_v30  ;;  %v2106_v2 = vrot.slane %v737_v59, %v1905_v30  ;;  %v540_v21 = vcombine.high %v2025_v13, %v1726_v39 }
  0xaf   : > { %v822_v12 = vpop.permute.xlu0 %821  ;;  %v845_v15 = vcombine.low %v820_v6, %v824_v11  ;;  %v846_v28 = vcombine.high %v820_v6, %v824_v11  ;;  %v381_v6 = vcombine.low %v1984_v25, %v1987_v26 }
  0xb0   : > { %v829_v17 = vcombine.low %v818_v7, %v822_v12  ;;  %562 = vrot.lane.b32.xlu0 %v2025_v13, %s1732_s7  ;;  %v830_v29 = vcombine.high %v818_v7, %v822_v12  ;;  %v769_v12 = vcombine.high %v2106_v2, %v1726_v39 }
  0xb1   : > { %v2030_v18 = vrot.slane %v845_v15, %v1886_v14  ;;  %v2056_v42 = vrot.slane %v846_v28, %v1886_v14  ;;  %v2115_v26 = vrot.slane %v381_v6, %v1905_v30 }
  0xb2   : > { %v2033_v19 = vrot.slane %v829_v17, %v1886_v14  ;;  %v1052_v22 = vpop.permute.xlu1 %1051  ;;  %v2059_v43 = vrot.slane %v830_v29, %v1886_v14  ;;  %v414_v29 = vcombine.high %v1994_v36, %v1726_v39 }
  0xb3   : > { %v1050_v23 = vpop.permute.xlu0 %1049  ;;  %v413_v17 = vcombine.high %v2115_v26, %v1726_v39 }
  0xb4   : > { %v862_v27 = vcombine.high %v2033_v19, %v2030_v18  ;;  %778 = vrot.lane.b32.xlu0 %v2038_v24, %s1728_s28  ;;  %v877_v53 = vcombine.low %v2059_v43, %v2056_v42  ;;  %v861_v28 = vcombine.low %v2033_v19, %v2030_v18  ;;  %v415_v18 = vcombine.high %v1999_v45, %v1726_v39 }
  0xb5   : > { %v1003_v45 = vcombine.high %v1979_v16, %v1726_v39 }
  0xb6   : > { %v2045_v31 = vrot.slane %v862_v27, %v1905_v30  ;;  %v1056_v34 = vpop.permute.xlu1 %1055  ;;  %v2102_v10 = vrot.slane %v877_v53, %v1905_v30  ;;  %v2145_v36 = vrot.slane %v861_v28, %v1905_v30 }
  0xb7   : > { %v1054_v35 = vpop.permute.xlu0 %1053  ;;  %v1077_v40 = vcombine.low %v1052_v22, %v1056_v34  ;;  %v1078_v44 = vcombine.high %v1052_v22, %v1056_v34 }
  0xb8   : > { %v1061_v41 = vcombine.low %v1050_v23, %v1054_v35  ;;  %902 = vrot.lane.b32.xlu1 %v2045_v31, %s1728_s28  ;;  %786 = vrot.lane.b32.xlu0 %v2048_v37, %s1730_s5  ;;  %v1062_v47 = vcombine.high %v1050_v23, %v1054_v35 }
  0xb9   : > { %v2064_v46 = vrot.slane %v1077_v40, %v1886_v14  ;;  %v2081_v56 = vrot.slane %v1078_v44, %v1886_v14 }
  0xba   : > { %v2067_v48 = vrot.slane %v1061_v41, %v1886_v14  ;;  %v2071_v50 = vpop.permute.xlu1 %1175  ;;  %v2084_v57 = vrot.slane %v1062_v47, %v1886_v14 }
  0xbb   : > { %v2073_v51 = vpop.permute.xlu0 %1173 }
  0xbc   : > { %v1094_v52 = vcombine.high %v2067_v48, %v2064_v46  ;;  %542 = vrot.lane.b32.xlu0 %v537_v49, %s1727_s27  ;;  %v1109_v7 = vcombine.low %v2084_v57, %v2081_v56  ;;  %v1093_v40 = vcombine.low %v2067_v48, %v2064_v46  ;;  %v754_v49 = vcombine.high %v2022_v9, %v2019_v8 }
  0xbe   : > { %v2087_v58 = vrot.slane %v1094_v52, %v1905_v30  ;;  %v2090_v0 = vpop.permute.xlu1 %1179  ;;  %v2112_v25 = vrot.slane %v1109_v7, %v1905_v30  ;;  %v2160_v48 = vrot.slane %v1093_v40, %v1905_v30  ;;  %v768_v9 = vrot.slane %v754_v49, %v1905_v30 }
  0xbf   : > { %v2092_v3 = vpop.permute.xlu0 %1177  ;;  %v1201_v59 = vcombine.low %v2071_v50, %v2090_v0 }
  0xc0   : > { %1134 = vrot.lane.b32.xlu1 %v2087_v58, %s1728_s28  ;;  %550 = vrot.lane.b32.xlu0 %v538_v60, %s1729_s29  ;;  %v1185_v60 = vcombine.low %v2073_v51, %v2092_v3  ;;  %v1125_v8 = vcombine.high %v2160_v48, %v1726_v39  ;;  %v772_v28 = vcombine.high %v768_v9, %v1726_v39 }
  0xc2   : > { %v651_v11 = vpop.permute.xlu1 %650 }
  0xc3   : > { %v288_v5 = vpop.permute.xlu0 %287  ;;  %v677_v20 = vsel %vm314_vm0, %v1913_v33, %v651_v11  ;;  %v770_v33 = vcombine.high %v2038_v24, %v1726_v39  ;;  %v771_v24 = vcombine.high %v2048_v37, %v1726_v39  ;;  %v1000_v11 = vrot.slane %v986_v4, %v1905_v30 }
  0xc4   : > { %910 = vrot.lane.b32.xlu1 %v2102_v10, %s1730_s5  ;;  %558 = vrot.lane.b32.xlu0 %v539_v55, %s1731_s6  ;;  %v315_v19 = vsel %vm314_vm0, %v1910_v32, %v288_v5  ;;  %v893_v32 = vcombine.high %v2145_v36, %v1726_v39  ;;  %v1202_v4 = vcombine.high %v2071_v50, %v2090_v0 }
  0xc6   : > { %v655_v15 = vpop.permute.xlu1 %654  ;;  %v1216_v50 = vrot.slane %v1202_v4, %v1886_v14 }
  0xc7   : > { %v292_v61 = vpop.permute.xlu0 %291  ;;  %v678_v27 = vsel %vm316_vm1, %v677_v20, %v655_v15  ;;  %v1193_v15 = vrot.slane %v1185_v60, %v1886_v14  ;;  %v416_v20 = vcombine.high %v2008_v54, %v1726_v39 }
  0xc8   : > { %1142 = vrot.lane.b32.xlu1 %v2112_v25, %s1730_s5  ;;  %774 = vrot.lane.b32.xlu0 %v769_v12, %s1727_s27  ;;  %v317_v46 = vsel %vm316_vm1, %v315_v19, %v292_v61  ;;  %v1209_v61 = vrot.slane %v1201_v59, %v1886_v14  ;;  %v895_v19 = vcombine.high %v2102_v10, %v1726_v39 }
  0xca   : > { %v659_v23 = vpop.permute.xlu1 %658 }
  0xcb   : > { %v296_v22 = vpop.permute.xlu0 %295  ;;  %v679_v35 = vsel %vm318_vm2, %v678_v27, %v659_v23  ;;  %v1217_v23 = vcombine.low %v1193_v15, %v1209_v61  ;;  %v894_v27 = vcombine.high %v2045_v31, %v1726_v39  ;;  %v1126_v31 = vcombine.high %v2087_v58, %v1726_v39 }
  0xcc   : > { %418 = vrot.lane.b32.xlu1 %v413_v17, %s1727_s27  ;;  %566 = vrot.lane.b32.xlu0 %v540_v21, %s1733_s8  ;;  %v319_v16 = vsel %vm318_vm2, %v317_v46, %v296_v22  ;;  %v1734_v22 = vmov 0.0|0.0   ;;  %v1127_v46 = vcombine.high %v2112_v25, %v1726_v39 }
  0xcd   : > { %1531 = vmatprep.subr.bf16.mxu0 %v1734_v22 }
  0xce   : > { %v663_v34 = vpop.permute.xlu1 %662 }
  0xcf   : > { %v300_v13 = vpop.permute.xlu0 %299  ;;  %v680_v44 = vsel %vm320_vm3, %v679_v35, %v663_v34 }
  0xd0   : > { %426 = vrot.lane.b32.xlu1 %v414_v29, %s1729_s29  ;;  %782 = vrot.lane.b32.xlu0 %v770_v33, %s1729_s29  ;;  %v321_v7 = vsel %vm320_vm3, %v319_v16, %v300_v13  ;;  %v1004_v33 = vcombine.high %v1000_v11, %v1726_v39 }
  0xd2   : > { %v667_v47 = vpop.permute.xlu1 %666 }
  0xd3   : > { %v304_v41 = vpop.permute.xlu0 %303  ;;  %v681_v37 = vsel %vm322_vm4, %v680_v44, %v667_v47 }
  0xd4   : > { %434 = vrot.lane.b32.xlu1 %v415_v18, %s1731_s6  ;;  %790 = vrot.lane.b32.xlu0 %v771_v24, %s1731_s6  ;;  %v323_v21 = vsel %vm322_vm4, %v321_v7, %v304_v41 }
  0xd6   : > { %v671_v53 = vpop.permute.xlu1 %670 }
  0xd7   : > { %v1007_v52 = vpop.permute.xlu0 %1006  ;;  %v682_v6 = vsel %vm324_vm5, %v681_v37, %v671_v53  ;;  %v1110_v37 = vcombine.high %v2084_v57, %v2081_v56  ;;  %v1737_v57 = vmov 1  }
  0xd8   : > { %898 = vrot.lane.b32.xlu1 %v893_v32, %s1727_s27  ;;  %1022 = vrot.lane.b32.xlu0 %v1003_v45, %s1731_s6  ;;  %v1033_v17 = vsel %vm314_vm0, %v1952_v1, %v1007_v52  ;;  %v1186_v1 = vcombine.high %v2073_v51, %v2092_v3  ;;  %v1218_v51 = vcombine.high %v1193_v15, %v1209_v61  ;;  %v1289_v52 = vld [vmem:[%s213_s20] sm:$0xf]  ;;  %s1630_s20 = sshll.u32 %s1738_s11, 4  ;;  %s1631_s20 = int_to_ptr.vmem [resolvable:$false] %s1630_s20 }
  0xd9   : > { %v2210_v3 = vrot.slane %v1217_v23, %v1905_v30  ;;  %v878_v45 = vcombine.high %v2059_v43, %v2056_v42  ;;  %v1124_v43 = vrot.slane %v1110_v37, %v1905_v30  ;;  %1625 = vset.pattern.permute.xlu0 %v1737_v57  ;;  %s1632_s4 = scalar_lea.vmem %s1631_s20, 128 }
  0xda   : > { %v675_v5 = vpop.permute.xlu1 %674  ;;  %v1200_v0 = vrot.slane %v1186_v1, %v1886_v14  ;;  %v1232_v18 = vrot.slane %v1218_v51, %v1905_v30 }
  0xdb   : > { %v308_v55 = vpop.permute.xlu0 %307  ;;  %v683_v12 = vsel %vm326_vm6, %v682_v6, %v675_v5  ;;  %v1249_v14 = vcombine.high %v2210_v3, %v1726_v39  ;;  %v892_v49 = vrot.slane %v878_v45, %v1905_v30  ;;  %v1128_v56 = vcombine.high %v1124_v43, %v1726_v39 }
  0xdc   : > { %1130 = vrot.lane.b32.xlu1 %v1125_v8, %s1727_s27  ;;  %794 = vrot.lane.b32.xlu0 %v768_v9, %s1732_s7  ;;  %684 = vst [vmem:[#allocation2 + $0xc] sm:$0xf] %v683_v12  ;;  %v325_v54 = vsel %vm324_vm5, %v323_v21, %v308_v55  ;;  %v1233_v40 = vcombine.low %v1200_v0, %v1216_v50 }
  0xdd   : > { %v1234_v41 = vcombine.high %v1200_v0, %v1216_v50  ;;  %v1250_v44 = vcombine.high %v1232_v18, %v1726_v39  ;;  %v896_v25 = vcombine.high %v892_v49, %v1726_v39 }
  0xde   : > { %v1241_v47 = vrot.slane %v1233_v40, %v1905_v30 }
  0xdf   : > { %v1011_v62 = vpop.permute.xlu0 %1010  ;;  %v1248_v32 = vrot.slane %v1234_v41, %v1905_v30  ;;  %v1736_v30 = vmov 0  }
  0xe0   : > { %442 = vrot.lane.b32.xlu1 %v416_v20, %s1733_s8  ;;  %v1034_v63 = vsel %vm316_vm1, %v1033_v17, %v1011_v62  ;;  %1026 = vrot.lane.b32.xlu0 %v1000_v11, %s1732_s7  ;;  %v1251_v10 = vcombine.high %v1241_v47, %v1726_v39 }
  0xe1   : > { %v1252_v42 = vcombine.high %v1248_v32, %v1726_v39  ;;  %1624 = vset.pattern.permute.xlu1 %v1736_v30 }
  0xe3   : > { %v312_v29 = vpop.permute.xlu0 %311 }
  0xe4   : > { %906 = vrot.lane.b32.xlu1 %v894_v27, %s1729_s29  ;;  %v327_v13 = vsel %vm326_vm6, %v325_v54, %v312_v29  ;;  %798 = vrot.lane.b32.xlu0 %v772_v28, %s1733_s8 }
  0xe5   : > { %328 = vst [vmem:[#allocation2] sm:$0xf] %v327_v13 }
  0xe7   : > { %v1015_v34 = vpop.permute.xlu0 %1014 }
  0xe8   : > { %1138 = vrot.lane.b32.xlu1 %v1126_v31, %s1729_s29  ;;  %v1035_v35 = vsel %vm318_vm2, %v1034_v63, %v1015_v34  ;;  %1030 = vrot.lane.b32.xlu0 %v1004_v33, %s1733_s8 }
  0xeb   : > { %v1019_v24 = vpop.permute.xlu0 %1018 }
  0xec   : > { %914 = vrot.lane.b32.xlu1 %v895_v19, %s1731_s6  ;;  %v2224_v58 = vsel %vm320_vm3, %v1035_v35, %v1019_v24  ;;  %1254 = vrot.lane.b32.xlu0 %v1249_v14, %s1727_s27  ;;  %s1500_s27 = sshll.u32 %s198_s24, 2 }
  0xf0   : > { %1146 = vrot.lane.b32.xlu1 %v1127_v46, %s1731_s6  ;;  %1262 = vrot.lane.b32.xlu0 %v1250_v44, %s1729_s29 }
  0xf4   : > { %918 = vrot.lane.b32.xlu1 %v892_v49, %s1732_s7  ;;  %1270 = vrot.lane.b32.xlu0 %v1251_v10, %s1731_s6  ;;  %s200_s6 = scalar_lea.vmem [#allocation3], %s1500_s27 }
  0xf8   : > { %1150 = vrot.lane.b32.xlu1 %v1124_v43, %s1732_s7  ;;  %1278 = vrot.lane.b32.xlu0 %v1252_v42, %s1733_s8 }
  0xfc   : > { %922 = vrot.lane.b32.xlu1 %v896_v25, %s1733_s8  ;;  %1381 = vperm.xlu0 %1625, %v1289_v52  }
 0x100   : > { %1154 = vrot.lane.b32.xlu1 %v1128_v56, %s1733_s8 }
 0x104   : > { %1258 = vrot.lane.b32.xlu1 %v1232_v18, %s1728_s28  ;;  %s1508_s28 = sshll.u32 %s1708_s16, 1 }
 0x105   : > { %s1398_s29 = sadd.s32 %s1704_s15, %s1508_s28  ;;  %s1387_s15 = scalar_lea.sflag [#allocation4], %s198_s24 }
 0x108   : > { %1266 = vrot.lane.b32.xlu1 %v1241_v47, %s1730_s5  ;;  %s1509_s5 = sshll.u32 %s1398_s29, 6 }
 0x109   : > { %s2327_s10 = scalar_lea.hbm %s2383_s3, %s1509_s5 }
 0x10c   : > { %1274 = vrot.lane.b32.xlu1 %v1248_v32, %s1732_s7  ;;  %s1402_s7 = sshll.u32 %s200_s6, 4  ;;  %s2329_s7 = int_to_ptr.vmem [resolvable:$true] %s1402_s7 }
 0x10d   : > { %s1626_s16 = scalar_lea.vmem %s2329_s7, 64  ;;  %p1633_p4 = scmp.lt.s32.totalorder %s2329_s7, %s1631_s20 }
 0x10e   : > { %p1627_p0 = scmp.ne.s32.totalorder %s2329_s7, %s1626_s16  ;;  %p1634_p5 = scmp.lt.s32.totalorder %s1632_s4, %s1626_s16 }
 0x110   : > { %1298 = vperm.xlu1 %1624, %v1289_v52   ;;  %p1628_p1 = pnand %p1627_p0, %p1810_p3  ;;  %p1635_p6 = por %p1634_p5, %p1633_p4 }
 0x112   : > { %v423_v16 = vpop.permute.xlu1 %422  ;;  %p1629_p2 = pneg %p1628_p1 }
 0x114   : > { %p1636_p7 = pnand %p1635_p6, %p1629_p2 }
 0x116   : > { %v431_v6 = vpop.permute.xlu1 %430 }
 0x11a   : > { %v547_v53 = vpop.permute.xlu0 %546  ;;  %v439_v9 = vpop.permute.xlu1 %438 }
 0x11e   : > { %v555_v59 = vpop.permute.xlu0 %554 }
 0x122   : > { %v563_v60 = vpop.permute.xlu0 %562 }
 0x126   : > { %v779_v8 = vpop.permute.xlu0 %778 }
 0x12a   : > { %v787_v7 = vpop.permute.xlu0 %786  ;;  %v903_v55 = vpop.permute.xlu1 %902 }
 0x12e   : > { %v543_v5 = vpop.permute.xlu0 %542 }
 0x12f   : > { %v569_v61 = vsel %vm314_vm0, %v2051_v38, %v543_v5 }
 0x130   : > { %v570_v17 = vsel %vm316_vm1, %v569_v61, %v547_v53 }
 0x132   : > { %v2258_v11 = vpop.permute.xlu1 %1134  ;;  %v551_v12 = vpop.permute.xlu0 %550 }
 0x133   : > { %v571_v21 = vsel %vm318_vm2, %v570_v17, %v551_v12 }
 0x134   : > { %v572_v63 = vsel %vm320_vm3, %v571_v21, %v555_v59 }
 0x136   : > { %v911_v15 = vpop.permute.xlu1 %910  ;;  %v559_v20 = vpop.permute.xlu0 %558 }
 0x137   : > { %v573_v1 = vsel %vm322_vm4, %v572_v63, %v559_v20 }
 0x138   : > { %v574_v54 = vsel %vm324_vm5, %v573_v1, %v563_v60 }
 0x13a   : > { %v2264_v62 = vpop.permute.xlu1 %1142  ;;  %v775_v4 = vpop.permute.xlu0 %774 }
 0x13b   : > { %v801_v35 = vsel %vm314_vm0, %v2106_v2, %v775_v4 }
 0x13c   : > { %v802_v24 = vsel %vm316_vm1, %v801_v35, %v779_v8 }
 0x13e   : > { %v419_v23 = vpop.permute.xlu1 %418  ;;  %v567_v27 = vpop.permute.xlu0 %566 }
 0x13f   : > { %v575_v28 = vsel %vm326_vm6, %v574_v54, %v567_v27  ;;  %v445_v13 = vsel %vm314_vm0, %v2115_v26, %v419_v23 }
 0x140   : > { %576 = vst [vmem:[#allocation2 + $0x8] sm:$0xf] %v575_v28  ;;  %v446_v0 = vsel %vm316_vm1, %v445_v13, %v423_v16 }
 0x142   : > { %v427_v38 = vpop.permute.xlu1 %426  ;;  %v783_v29 = vpop.permute.xlu0 %782 }
 0x143   : > { %v447_v31 = vsel %vm318_vm2, %v446_v0, %v427_v38  ;;  %v803_v26 = vsel %vm318_vm2, %v802_v24, %v783_v29 }
 0x144   : > { %v448_v40 = vsel %vm320_vm3, %v447_v31, %v431_v6  ;;  %v804_v46 = vsel %vm320_vm3, %v803_v26, %v787_v7 }
 0x146   : > { %v435_v33 = vpop.permute.xlu1 %434  ;;  %v791_v50 = vpop.permute.xlu0 %790 }
 0x147   : > { %v449_v18 = vsel %vm322_vm4, %v448_v40, %v435_v33  ;;  %v805_v2 = vsel %vm322_vm4, %v804_v46, %v791_v50  ;;  %v1292_v57 = vld [vmem:[#allocation2 + $0x8] sm:$0xff] }
 0x148   : > { %v450_v41 = vsel %vm324_vm5, %v449_v18, %v439_v9 }
 0x14a   : > { %v899_v51 = vpop.permute.xlu1 %898  ;;  %v1023_v34 = vpop.permute.xlu0 %1022 }
 0x14b   : > { %v1037_v42 = vsel %vm322_vm4, %v2224_v58, %v1023_v34  ;;  %v925_v60 = vsel %vm314_vm0, %v2145_v36, %v899_v51  ;;  %v1290_v34 = vld [vmem:[%s2381_s1] sm:$0xf] }
 0x14c   : > { %v926_v58 = vsel %vm316_vm1, %v925_v60, %v903_v55 }
 0x14e   : > { %v1131_v14 = vpop.permute.xlu1 %1130  ;;  %v795_v19 = vpop.permute.xlu0 %794 }
 0x14f   : > { %v806_v32 = vsel %vm324_vm5, %v805_v2, %v795_v19  ;;  %v1157_v8 = vsel %vm314_vm0, %v2160_v48, %v1131_v14 }
 0x150   : > { %v1158_v5 = vsel %vm316_vm1, %v1157_v8, %v2258_v11 }
 0x152   : > { %v443_v44 = vpop.permute.xlu1 %442  ;;  %v1027_v45 = vpop.permute.xlu0 %1026 }
 0x153   : > { %v451_v47 = vsel %vm326_vm6, %v450_v41, %v443_v44  ;;  %v1038_v25 = vsel %vm324_vm5, %v1037_v42, %v1027_v45 }
 0x154   : > { %452 = vst [vmem:[#allocation2 + $0x4] sm:$0xf] %v451_v47 }
 0x156   : > { %v907_v10 = vpop.permute.xlu1 %906  ;;  %v799_v37 = vpop.permute.xlu0 %798 }
 0x157   : > { %v807_v49 = vsel %vm326_vm6, %v806_v32, %v799_v37  ;;  %v927_v9 = vsel %vm318_vm2, %v926_v58, %v907_v10 }
 0x158   : > { %808 = vst [vmem:[#allocation2 + $0x10] sm:$0xf] %v807_v49  ;;  %v928_v12 = vsel %vm320_vm3, %v927_v9, %v911_v15 }
 0x15a   : > { %v1139_v43 = vpop.permute.xlu1 %1138  ;;  %v1031_v56 = vpop.permute.xlu0 %1030 }
 0x15b   : > { %v1291_v30 = vld [vmem:[#allocation2] sm:$0xff]  ;;  %v1039_v52 = vsel %vm326_vm6, %v1038_v25, %v1031_v56 }
 0x15c   : > { %v1532_v53 = vpack.c.bf16 %v1292_v57, %v1291_v30  ;;  %1040 = vst [vmem:[#allocation2 + $0x18] sm:$0xf] %v1039_v52 }
 0x15e   : > { %v915_v16 = vpop.permute.xlu1 %914  ;;  %1533 = vmatpush3.bf16.msra.mxu0 %v1532_v53  ;;  %v1255_v20 = vpop.permute.xlu0 %1254 }
 0x15f   : > { %1534 = vmatprep.subr.bf16.mxu0 %v1734_v22  ;;  %v1159_v22 = vsel %vm318_vm2, %v1158_v5, %v1139_v43  ;;  %v929_v61 = vsel %vm322_vm4, %v928_v12, %v915_v16  ;;  %v1281_v1 = vsel %vm314_vm0, %v2210_v3, %v1255_v20 }
 0x160   : > { %v1160_v48 = vsel %vm320_vm3, %v1159_v22, %v2264_v62 }
 0x162   : > { %v1147_v59 = vpop.permute.xlu1 %1146  ;;  %v1263_v15 = vpop.permute.xlu0 %1262 }
 0x163   : > { %v1161_v21 = vsel %vm322_vm4, %v1160_v48, %v1147_v59 }
 0x166   : > { %v919_v6 = vpop.permute.xlu1 %918  ;;  %v1271_v27 = vpop.permute.xlu0 %1270 }
 0x167   : > { %v930_v36 = vsel %vm324_vm5, %v929_v61, %v919_v6 }
 0x16a   : > { %v1151_v7 = vpop.permute.xlu1 %1150  ;;  %v1279_v3 = vpop.permute.xlu0 %1278 }
 0x16b   : > { %v1162_v11 = vsel %vm324_vm5, %v1161_v21, %v1151_v7 }
 0x16e   : > { %v923_v17 = vpop.permute.xlu1 %922 }
 0x16f   : > { %v931_v55 = vsel %vm326_vm6, %v930_v36, %v923_v17 }
 0x170   : > { %932 = vst [vmem:[#allocation2 + $0x14] sm:$0xf] %v931_v55 }
 0x172   : > { %v1155_v63 = vpop.permute.xlu1 %1154 }
 0x173   : > { %v1163_v4 = vsel %vm326_vm6, %v1162_v11, %v1155_v63 }
 0x174   : > { %1164 = vst [vmem:[#allocation2 + $0x1c] sm:$0xf] %v1163_v4 }
 0x176   : > { %v1259_v23 = vpop.permute.xlu1 %1258 }
 0x177   : > { %v1282_v54 = vsel %vm316_vm1, %v1281_v1, %v1259_v23  ;;  %v1293_v29 = vld [vmem:[#allocation2 + $0x10] sm:$0xff] }
 0x178   : > { %v1283_v62 = vsel %vm318_vm2, %v1282_v54, %v1263_v15 }
 0x17a   : > { %v1267_v28 = vpop.permute.xlu1 %1266 }
 0x17b   : > { %v1284_v38 = vsel %vm320_vm3, %v1283_v62, %v1267_v28  ;;  %v1294_v33 = vld [vmem:[#allocation2 + $0x18] sm:$0xff]  ;;  %v1382_v19 = vpop.permute.xlu0 %1381 }
 0x17c   : > { %v1535_v13 = vpack.c.bf16 %v1294_v33, %v1293_v29  ;;  %v1285_v0 = vsel %vm322_vm4, %v1284_v38, %v1271_v27 }
 0x17e   : > { %v1275_v50 = vpop.permute.xlu1 %1274  ;;  %1536 = vmatpush3.bf16.msra.mxu0 %v1535_v13 }
 0x17f   : > { %v1286_v51 = vsel %vm324_vm5, %v1285_v0, %v1275_v50  ;;  %1526 = vmatprep.subr.mxu0 %v1726_v39 }
 0x180   : > { %v1287_v31 = vsel %vm326_vm6, %v1286_v51, %v1279_v3 }
 0x181   : > { %1288 = vst [vmem:[#allocation2 + $0x20] sm:$0xf] %v1287_v31 }
 0x188   : > { %v1295_v35 = vld [vmem:[#allocation2 + $0x20] sm:$0xf] }
 0x189   : > { %1527 = vmatpush3.msk.msra.mxu0 %vm1305_vm8, %v1295_v35 }
 0x18a   : > { %1529 = vmatmul.mubr.msk.f32.vlgmr.msra.gmra.mrb[0].mxu0 %vm1301_vm9, %v1290_v34 }
 0x18f   : > { %v1299_v40 = vpop.permute.xlu1 %1298 }
 0x25d   : > { %v1375_v14 = vpop.f32.mrb[0].mxu0 }
 0x25e   : > { %v1376_v39 = vadd.f32 %v1375_v14, %v1299_v40  ;;  %v1530_v18 = vpop.f32.mrb[1].mxu0 }
 0x260   : > { %v1379_v24 = vmax.f32 %v1376_v39, 0.0 }
 0x262   : > { %v1384_v26 = vmul.f32 %v1382_v19, %v1379_v24 }
 0x264   : > { %1385 = vst [vmem:[%s200_s6] sm:$0xf] %v1384_v26 }
 0x265   : > { %1639 = shalt.err (!%p1636_p7)
}
 0x266   : > { %s1640_s21 = scalar_lea.hbm %s2327_s10, 64  ;;  %s1644_s28 = scalar_lea.hbm %s2383_s3, 256 }
 0x267   : > { %p1641_p9 = scmp.ne.s32.totalorder %s2327_s10, %s1640_s21  ;;  %p1645_p12 = scmp.lt.u32.totalorder %s2327_s10, %s2383_s3 }
 0x268   : > { %p1646_p13 = scmp.lt.u32.totalorder %s1644_s28, %s1640_s21  ;;  %p1648_p1 = scmp.lt.u32.totalorder %s1640_s21, %s2327_s10 }
 0x269   : > { %p1642_p10 = pnand %p1641_p9, %p1810_p3 }
 0x26a   : > { %p1647_p0 = por %p1646_p13, %p1645_p12 }
 0x26b   : > { %p1643_p11 = pneg %p1642_p10 }
 0x26c   : > { %p1649_p2 = por %p1648_p1, %p1647_p0 }
 0x26e   : > { %p1650_p4 = pnand %p1649_p2, %p1643_p11 }
 0x270   : > { %1653 = shalt.err (!%p1650_p4)
}
 0x271   : > { %1537 = dma.vmem_to_hbm [thread:$0]  (%p1810_p3), %s2329_s7, 64, %s2327_s10, %s1387_s15  }
 0x272 PF: > { %p1543_p5 = scmp.ge.s32.totalorder %s1720_s19, 2  ;;  %s1414_s6 = sand.u32 1, %s1692_s12  }
 0x273   : > { %s1415_s8 = scalar_lea.sflag [#allocation4], %s1414_s6 }
 0x274   : > { %p1540_p6 = pnand %p1543_p5, %p1819_p8 }
 0x276   : > { %1687 = dma.done.wait (!%p1540_p6), %s1415_s8, 64  }
 0x277   : > { %1689 = vsyncadd (!%p1540_p6), %s1415_s8, 4294967232  ;;  %s16_s19 = sadd.s32 1, %s1720_s19   ;;  %s2386_s12 = smov %s1696_s13 }
 0x278   : > { %p13_p7 = scmp.ge.s32.totalorder %s16_s19, 6   ;;  %s2387_s13 = smov %s1700_s14 }
 0x279   : > { %s2388_s14 = smov %s1828_s30  ;;  %s2389_s15 = smov %s1712_s17 }
 0x27a   : > { %s2390_s16 = smov %s1716_s18  ;;  %s2391_s17 = smov %s2394_s22 }
 0x27b   : > { %s2392_s18 = smov %s2398_s23  ;;  %15 = sbr.rel (!%p13_p7) target bundleno = 5 (0x5), region = 70 }
 0x282   :  { %1420 = vsyncpa [#allocation4], 1 }
 0x283   :  { %1422 = vsyncpa [#allocation4 + $0x1], 1 }

</bundles_post_ra>
